<compile_context>
chip_gen: v7x
topology: tpu7x:2x2x1
jax: 0.10.0
libtpu: 0.0.40
codegen_flags: <defaults>
</compile_context>

<pallas_src>
import jax
import jax.numpy as jnp
from jax import lax
from jax.experimental import pallas as pl
from jax.experimental.pallas import tpu as pltpu

EPS = 1e-5  # BatchNorm2d default eps


def fused_kernel(x_ref, p_ref, o_ref, v3_ref):
    """x_ref:  (N, 2*Cin, P)   zero-padded inputs of conv1/conv2, channel-stacked
       p_ref:  (Cout, 2*Cin+5) packed params [w1 | w2 | b1+b2 | g1 | be1 | g2 | be2]
       o_ref:  (3, N, Cout, P) stacked output planes [bn1(v3), bn2(v3), sigmoid(v3)]
       v3_ref: (N, Cout, P)    VMEM scratch holding the fused conv output
    """
    n, c2, p = x_ref.shape
    cout = o_ref.shape[2]
    inv_m = 1.0 / float(n * p)

    # ---- hoisted parameter reads / broadcasts (done once, outside loops) ----
    w_b = [jnp.broadcast_to(p_ref[:, ci:ci + 1], (cout, p)) for ci in range(c2)]
    bias_b = jnp.broadcast_to(p_ref[:, c2:c2 + 1], (cout, p))     # b1 + b2
    g1 = p_ref[:, c2 + 1:c2 + 2]
    be1 = p_ref[:, c2 + 2:c2 + 3]
    g2 = p_ref[:, c2 + 3:c2 + 4]
    be2 = p_ref[:, c2 + 4:c2 + 5]

    # ---- pass 1: fused conv1+conv2+add, spill v3 to scratch, vector sum -----
    def conv_body(i, s_vec):
        acc = bias_b
        for ci in range(c2):                       # 2*Cin unrolled VPU MACs
            acc = acc + w_b[ci] * x_ref[i, ci:ci + 1, :]
        v3_ref[i] = acc
        return s_vec + acc

    s_vec = lax.fori_loop(0, n, conv_body,
                          jnp.zeros((cout, p), jnp.float32), unroll=True)
    mean = jnp.sum(s_vec, axis=1, keepdims=True) * inv_m          # (Cout, 1)

    # ---- pass 2: two-pass (numerically stable) biased batch variance --------
    def var_body(i, q_vec):
        d = v3_ref[i] - mean
        return q_vec + d * d

    q_vec = lax.fori_loop(0, n, var_body,
                          jnp.zeros((cout, p), jnp.float32), unroll=True)
    var = jnp.sum(q_vec, axis=1, keepdims=True) * inv_m
    inv_std = 1.0 / jnp.sqrt(var + EPS)

    a1 = g1 * inv_std
    c1 = be1 - mean * a1
    a2 = g2 * inv_std
    d2 = be2 - mean * a2

    # ---- pass 3: normalize / sigmoid, lane-dense stores ---------------------
    def out_body(i, carry):
        x = v3_ref[i]
        o_ref[0, i] = a1 * x + c1                  # bn1(v3)
        o_ref[1, i] = a2 * x + d2                  # bn2(v3)
        o_ref[2, i] = 1.0 / (1.0 + jnp.exp(-x))    # exact sigmoid (EUP exp)
        return carry

    lax.fori_loop(0, n, out_body, 0, unroll=True)


@jax.jit
def model_forward(x1, x2, params):
    """x1, x2: NCHW float32 arrays of identical shape (N, Cin, H, W).

    Returns torch.stack([bn1(v3), bn2(v3), sigmoid(v3)], -1) in the
    kernel-native (3, N, Cout, H+2, W+2) layout (stack axis leading) per the
    perf review; the lane-sparse transpose back is intentionally skipped.
    """
    N, C, H, W = x1.shape
    Hp, Wp = H + 2, W + 2
    P = Hp * Wp
    Cout = params["w1"].shape[0]

    # conv padding=1 applied to the inputs: a 1x1 conv of a zero pixel is just
    # the bias, so zero-padding the inputs yields the padded conv output (and
    # correct BN border statistics) directly.  Channel-concat x1/x2 so the
    # kernel sees a single fused input (one pad, one DMA).
    x = jnp.concatenate([x1, x2], axis=1)                     # (N, 2C, H, W)
    x = jnp.pad(x, ((0, 0), (0, 0), (1, 1), (1, 1)))          # (N, 2C, Hp, Wp)
    x = x.reshape(N, 2 * C, P)

    # Pack every per-output-channel scalar into one (Cout, 2C+5) slab:
    #   [ w1 (C) | w2 (C) | b1+b2 | gamma1 | beta1 | gamma2 | beta2 ]
    col = lambda v: v.reshape(Cout, 1)
    pk = jnp.concatenate(
        [params["w1"].reshape(Cout, C),
         params["w2"].reshape(Cout, C),
         col(params["b1"] + params["b2"]),
         col(params["bn1_gamma"]), col(params["bn1_beta"]),
         col(params["bn2_gamma"]), col(params["bn2_beta"])],
        axis=1).astype(jnp.float32)

    out = pl.pallas_call(
        fused_kernel,
        out_shape=jax.ShapeDtypeStruct((3, N, Cout, P), jnp.float32),
        in_specs=[pl.BlockSpec(memory_space=pltpu.MemorySpace.VMEM),
                  pl.BlockSpec(memory_space=pltpu.MemorySpace.VMEM)],
        out_specs=pl.BlockSpec(memory_space=pltpu.MemorySpace.VMEM),
        scratch_shapes=[pltpu.VMEM((N, Cout, P), jnp.float32)],
    )(x, pk)

    # Contiguous (free) reshape only -- no lane-sparse transpose.
    # TODO(synk): self.conv3 (Conv2d(4,8,1)) cannot be applied to the 5-D,
    # 8-channel stacked tensor v7; the PyTorch reference forward raises there.
    return out.reshape(3, N, Cout, Hp, Wp)


def _reference(x1, x2, params):
    """Pure-JAX reference of the (valid prefix of the) PyTorch forward."""
    def conv1x1_pad(x, w, b):
        xp = jnp.pad(x, ((0, 0), (0, 0), (1, 1), (1, 1)))
        w2 = w.reshape(w.shape[0], x.shape[1])                    # (Cout, Cin)
        y = (xp[:, None, :, :, :] * w2[None, :, :, None, None]).sum(axis=2)
        return y + b.reshape(1, -1, 1, 1)

    v3 = (conv1x1_pad(x1, params["w1"], params["b1"])
          + conv1x1_pad(x2, params["w2"], params["b2"]))

    def bn(v, g, b):
        m = v.mean(axis=(0, 2, 3), keepdims=True)
        var = v.var(axis=(0, 2, 3), keepdims=True)
        return (g.reshape(1, -1, 1, 1) * (v - m) / jnp.sqrt(var + EPS)
                + b.reshape(1, -1, 1, 1))

    v4 = bn(v3, params["bn1_gamma"], params["bn1_beta"])
    v5 = bn(v3, params["bn2_gamma"], params["bn2_beta"])
    v6 = jax.nn.sigmoid(v3)
    return jnp.stack([v4, v5, v6], axis=0)       # (3, N, Cout, Hp, Wp)


def init_params(key):
    kc = jax.random.split(key, 4)
    return {
        "w1": jax.random.normal(kc[0], (8, 3, 1, 1), jnp.float32) * 0.1,
        "b1": jax.random.normal(kc[1], (8,), jnp.float32) * 0.1,
        "w2": jax.random.normal(kc[2], (8, 3, 1, 1), jnp.float32) * 0.1,
        "b2": jax.random.normal(kc[3], (8,), jnp.float32) * 0.1,
        # BatchNorm2d defaults: gamma=1, beta=0
        "bn1_gamma": jnp.ones((8,), jnp.float32),
        "bn1_beta": jnp.zeros((8,), jnp.float32),
        "bn2_gamma": jnp.ones((8,), jnp.float32),
        "bn2_beta": jnp.zeros((8,), jnp.float32),
    }


if __name__ == "__main__":
    key = jax.random.PRNGKey(0)
    k1, k2, kp = jax.random.split(key, 3)

    N, C, H, W = 2, 3, 16, 16
    x1 = jax.random.normal(k1, (N, C, H, W), jnp.float32)
    x2 = jax.random.normal(k2, (N, C, H, W), jnp.float32)
    params = init_params(kp)

    out = model_forward(x1, x2, params)
    out = jax.block_until_ready(out)
    assert out.shape == (3, N, 8, H + 2, W + 2), out.shape

    ref = jax.block_until_ready(_reference(x1, x2, params))
    assert bool(jnp.all(jnp.isfinite(out)))
    assert bool(jnp.allclose(out, ref, rtol=1e-3, atol=1e-3)), \
        float(jnp.max(jnp.abs(out - ref)))
    print("KERNEL_OK")
</pallas_src>

<mosaic_0001>
module attributes {stable_mosaic.version = 11 : i64} {
  func.func @fused_kernel(%arg0: memref<2x6x324xf32, #tpu.memory_space<vmem>>, %arg1: memref<8x11xf32, #tpu.memory_space<vmem>>, %arg2: memref<3x2x8x324xf32, #tpu.memory_space<vmem>>, %arg3: memref<2x8x324xf32, #tpu.memory_space<vmem>>) attributes {dimension_semantics = [], scalar_prefetch = 0 : i64, scratch_operands = 1 : i64, tpu.core_type = #tpu.core_type<tc>} {
    %c0 = arith.constant 0 : index
    %c0_0 = arith.constant 0 : index
    %0 = vector.load %arg1[%c0, %c0_0] : memref<8x11xf32, #tpu.memory_space<vmem>>, vector<8x1xf32>
    %1 = vector.shape_cast %0 : vector<8x1xf32> to vector<8x1xf32>
    %2 = vector.broadcast %1 : vector<8x1xf32> to vector<8x324xf32>
    %c0_1 = arith.constant 0 : index
    %c1 = arith.constant 1 : index
    %3 = vector.load %arg1[%c0_1, %c1] : memref<8x11xf32, #tpu.memory_space<vmem>>, vector<8x1xf32>
    %4 = vector.shape_cast %3 : vector<8x1xf32> to vector<8x1xf32>
    %5 = vector.broadcast %4 : vector<8x1xf32> to vector<8x324xf32>
    %c0_2 = arith.constant 0 : index
    %c2 = arith.constant 2 : index
    %6 = vector.load %arg1[%c0_2, %c2] : memref<8x11xf32, #tpu.memory_space<vmem>>, vector<8x1xf32>
    %7 = vector.shape_cast %6 : vector<8x1xf32> to vector<8x1xf32>
    %8 = vector.broadcast %7 : vector<8x1xf32> to vector<8x324xf32>
    %c0_3 = arith.constant 0 : index
    %c3 = arith.constant 3 : index
    %9 = vector.load %arg1[%c0_3, %c3] : memref<8x11xf32, #tpu.memory_space<vmem>>, vector<8x1xf32>
    %10 = vector.shape_cast %9 : vector<8x1xf32> to vector<8x1xf32>
    %11 = vector.broadcast %10 : vector<8x1xf32> to vector<8x324xf32>
    %c0_4 = arith.constant 0 : index
    %c4 = arith.constant 4 : index
    %12 = vector.load %arg1[%c0_4, %c4] : memref<8x11xf32, #tpu.memory_space<vmem>>, vector<8x1xf32>
    %13 = vector.shape_cast %12 : vector<8x1xf32> to vector<8x1xf32>
    %14 = vector.broadcast %13 : vector<8x1xf32> to vector<8x324xf32>
    %c0_5 = arith.constant 0 : index
    %c5 = arith.constant 5 : index
    %15 = vector.load %arg1[%c0_5, %c5] : memref<8x11xf32, #tpu.memory_space<vmem>>, vector<8x1xf32>
    %16 = vector.shape_cast %15 : vector<8x1xf32> to vector<8x1xf32>
    %17 = vector.broadcast %16 : vector<8x1xf32> to vector<8x324xf32>
    %c0_6 = arith.constant 0 : index
    %c6 = arith.constant 6 : index
    %18 = vector.load %arg1[%c0_6, %c6] : memref<8x11xf32, #tpu.memory_space<vmem>>, vector<8x1xf32>
    %19 = vector.shape_cast %18 : vector<8x1xf32> to vector<8x1xf32>
    %20 = vector.broadcast %19 : vector<8x1xf32> to vector<8x324xf32>
    %c0_7 = arith.constant 0 : index
    %c7 = arith.constant 7 : index
    %21 = vector.load %arg1[%c0_7, %c7] : memref<8x11xf32, #tpu.memory_space<vmem>>, vector<8x1xf32>
    %c0_8 = arith.constant 0 : index
    %c8 = arith.constant 8 : index
    %22 = vector.load %arg1[%c0_8, %c8] : memref<8x11xf32, #tpu.memory_space<vmem>>, vector<8x1xf32>
    %c0_9 = arith.constant 0 : index
    %c9 = arith.constant 9 : index
    %23 = vector.load %arg1[%c0_9, %c9] : memref<8x11xf32, #tpu.memory_space<vmem>>, vector<8x1xf32>
    %c0_10 = arith.constant 0 : index
    %c10 = arith.constant 10 : index
    %24 = vector.load %arg1[%c0_10, %c10] : memref<8x11xf32, #tpu.memory_space<vmem>>, vector<8x1xf32>
    %cst = arith.constant 0.000000e+00 : f32
    %25 = vector.broadcast %cst : f32 to vector<8x324xf32>
    %c0_i32 = arith.constant 0 : i32
    %26 = arith.index_cast %c0_i32 : i32 to index
    %c0_11 = arith.constant 0 : index
    %c0_12 = arith.constant 0 : index
    %27 = vector.load %arg0[%26, %c0_11, %c0_12] : memref<2x6x324xf32, #tpu.memory_space<vmem>>, vector<1x1x324xf32>
    %28 = vector.shape_cast %27 : vector<1x1x324xf32> to vector<1x324xf32>
    %29 = vector.broadcast %28 : vector<1x324xf32> to vector<8x324xf32>
    %30 = arith.mulf %2, %29 : vector<8x324xf32>
    %31 = arith.addf %20, %30 : vector<8x324xf32>
    %32 = arith.index_cast %c0_i32 : i32 to index
    %c1_13 = arith.constant 1 : index
    %c0_14 = arith.constant 0 : index
    %33 = vector.load %arg0[%32, %c1_13, %c0_14] : memref<2x6x324xf32, #tpu.memory_space<vmem>>, vector<1x1x324xf32>
    %34 = vector.shape_cast %33 : vector<1x1x324xf32> to vector<1x324xf32>
    %35 = vector.broadcast %34 : vector<1x324xf32> to vector<8x324xf32>
    %36 = arith.mulf %5, %35 : vector<8x324xf32>
    %37 = arith.addf %31, %36 : vector<8x324xf32>
    %38 = arith.index_cast %c0_i32 : i32 to index
    %c2_15 = arith.constant 2 : index
    %c0_16 = arith.constant 0 : index
    %39 = vector.load %arg0[%38, %c2_15, %c0_16] : memref<2x6x324xf32, #tpu.memory_space<vmem>>, vector<1x1x324xf32>
    %40 = vector.shape_cast %39 : vector<1x1x324xf32> to vector<1x324xf32>
    %41 = vector.broadcast %40 : vector<1x324xf32> to vector<8x324xf32>
    %42 = arith.mulf %8, %41 : vector<8x324xf32>
    %43 = arith.addf %37, %42 : vector<8x324xf32>
    %44 = arith.index_cast %c0_i32 : i32 to index
    %c3_17 = arith.constant 3 : index
    %c0_18 = arith.constant 0 : index
    %45 = vector.load %arg0[%44, %c3_17, %c0_18] : memref<2x6x324xf32, #tpu.memory_space<vmem>>, vector<1x1x324xf32>
    %46 = vector.shape_cast %45 : vector<1x1x324xf32> to vector<1x324xf32>
    %47 = vector.broadcast %46 : vector<1x324xf32> to vector<8x324xf32>
    %48 = arith.mulf %11, %47 : vector<8x324xf32>
    %49 = arith.addf %43, %48 : vector<8x324xf32>
    %50 = arith.index_cast %c0_i32 : i32 to index
    %c4_19 = arith.constant 4 : index
    %c0_20 = arith.constant 0 : index
    %51 = vector.load %arg0[%50, %c4_19, %c0_20] : memref<2x6x324xf32, #tpu.memory_space<vmem>>, vector<1x1x324xf32>
    %52 = vector.shape_cast %51 : vector<1x1x324xf32> to vector<1x324xf32>
    %53 = vector.broadcast %52 : vector<1x324xf32> to vector<8x324xf32>
    %54 = arith.mulf %14, %53 : vector<8x324xf32>
    %55 = arith.addf %49, %54 : vector<8x324xf32>
    %56 = arith.index_cast %c0_i32 : i32 to index
    %c5_21 = arith.constant 5 : index
    %c0_22 = arith.constant 0 : index
    %57 = vector.load %arg0[%56, %c5_21, %c0_22] : memref<2x6x324xf32, #tpu.memory_space<vmem>>, vector<1x1x324xf32>
    %58 = vector.shape_cast %57 : vector<1x1x324xf32> to vector<1x324xf32>
    %59 = vector.broadcast %58 : vector<1x324xf32> to vector<8x324xf32>
    %60 = arith.mulf %17, %59 : vector<8x324xf32>
    %61 = arith.addf %55, %60 : vector<8x324xf32>
    %62 = arith.index_cast %c0_i32 : i32 to index
    %c0_23 = arith.constant 0 : index
    %c0_24 = arith.constant 0 : index
    %63 = vector.load %arg3[%62, %c0_23, %c0_24] : memref<2x8x324xf32, #tpu.memory_space<vmem>>, vector<1x8x324xf32>
    %64 = vector.shape_cast %63 : vector<1x8x324xf32> to vector<8x324xf32>
    %65 = vector.shape_cast %61 : vector<8x324xf32> to vector<1x8x324xf32>
    tpu.vector_store %arg3[%62, %c0_23, %c0_24], %65 {strides = array<i32>} : memref<2x8x324xf32, #tpu.memory_space<vmem>>, vector<1x8x324xf32>,
    %66 = arith.addf %25, %61 : vector<8x324xf32>
    %c1_i32 = arith.constant 1 : i32
    %67 = arith.index_cast %c1_i32 : i32 to index
    %c0_25 = arith.constant 0 : index
    %c0_26 = arith.constant 0 : index
    %68 = vector.load %arg0[%67, %c0_25, %c0_26] : memref<2x6x324xf32, #tpu.memory_space<vmem>>, vector<1x1x324xf32>
    %69 = vector.shape_cast %68 : vector<1x1x324xf32> to vector<1x324xf32>
    %70 = vector.broadcast %69 : vector<1x324xf32> to vector<8x324xf32>
    %71 = arith.mulf %2, %70 : vector<8x324xf32>
    %72 = arith.addf %20, %71 : vector<8x324xf32>
    %73 = arith.index_cast %c1_i32 : i32 to index
    %c1_27 = arith.constant 1 : index
    %c0_28 = arith.constant 0 : index
    %74 = vector.load %arg0[%73, %c1_27, %c0_28] : memref<2x6x324xf32, #tpu.memory_space<vmem>>, vector<1x1x324xf32>
    %75 = vector.shape_cast %74 : vector<1x1x324xf32> to vector<1x324xf32>
    %76 = vector.broadcast %75 : vector<1x324xf32> to vector<8x324xf32>
    %77 = arith.mulf %5, %76 : vector<8x324xf32>
    %78 = arith.addf %72, %77 : vector<8x324xf32>
    %79 = arith.index_cast %c1_i32 : i32 to index
    %c2_29 = arith.constant 2 : index
    %c0_30 = arith.constant 0 : index
    %80 = vector.load %arg0[%79, %c2_29, %c0_30] : memref<2x6x324xf32, #tpu.memory_space<vmem>>, vector<1x1x324xf32>
    %81 = vector.shape_cast %80 : vector<1x1x324xf32> to vector<1x324xf32>
    %82 = vector.broadcast %81 : vector<1x324xf32> to vector<8x324xf32>
    %83 = arith.mulf %8, %82 : vector<8x324xf32>
    %84 = arith.addf %78, %83 : vector<8x324xf32>
    %85 = arith.index_cast %c1_i32 : i32 to index
    %c3_31 = arith.constant 3 : index
    %c0_32 = arith.constant 0 : index
    %86 = vector.load %arg0[%85, %c3_31, %c0_32] : memref<2x6x324xf32, #tpu.memory_space<vmem>>, vector<1x1x324xf32>
    %87 = vector.shape_cast %86 : vector<1x1x324xf32> to vector<1x324xf32>
    %88 = vector.broadcast %87 : vector<1x324xf32> to vector<8x324xf32>
    %89 = arith.mulf %11, %88 : vector<8x324xf32>
    %90 = arith.addf %84, %89 : vector<8x324xf32>
    %91 = arith.index_cast %c1_i32 : i32 to index
    %c4_33 = arith.constant 4 : index
    %c0_34 = arith.constant 0 : index
    %92 = vector.load %arg0[%91, %c4_33, %c0_34] : memref<2x6x324xf32, #tpu.memory_space<vmem>>, vector<1x1x324xf32>
    %93 = vector.shape_cast %92 : vector<1x1x324xf32> to vector<1x324xf32>
    %94 = vector.broadcast %93 : vector<1x324xf32> to vector<8x324xf32>
    %95 = arith.mulf %14, %94 : vector<8x324xf32>
    %96 = arith.addf %90, %95 : vector<8x324xf32>
    %97 = arith.index_cast %c1_i32 : i32 to index
    %c5_35 = arith.constant 5 : index
    %c0_36 = arith.constant 0 : index
    %98 = vector.load %arg0[%97, %c5_35, %c0_36] : memref<2x6x324xf32, #tpu.memory_space<vmem>>, vector<1x1x324xf32>
    %99 = vector.shape_cast %98 : vector<1x1x324xf32> to vector<1x324xf32>
    %100 = vector.broadcast %99 : vector<1x324xf32> to vector<8x324xf32>
    %101 = arith.mulf %17, %100 : vector<8x324xf32>
    %102 = arith.addf %96, %101 : vector<8x324xf32>
    %103 = arith.index_cast %c1_i32 : i32 to index
    %c0_37 = arith.constant 0 : index
    %c0_38 = arith.constant 0 : index
    %104 = vector.load %arg3[%103, %c0_37, %c0_38] : memref<2x8x324xf32, #tpu.memory_space<vmem>>, vector<1x8x324xf32>
    %105 = vector.shape_cast %104 : vector<1x8x324xf32> to vector<8x324xf32>
    %106 = vector.shape_cast %102 : vector<8x324xf32> to vector<1x8x324xf32>
    tpu.vector_store %arg3[%103, %c0_37, %c0_38], %106 {strides = array<i32>} : memref<2x8x324xf32, #tpu.memory_space<vmem>>, vector<1x8x324xf32>,
    %107 = arith.addf %66, %102 : vector<8x324xf32>
    %c2_i32 = arith.constant 2 : i32
    %cst_39 = arith.constant dense<0.000000e+00> : vector<8xf32>
    %108 = vector.multi_reduction <add>, %107, %cst_39 [1] : vector<8x324xf32> to vector<8xf32>
    %109 = vector.shape_cast %108 : vector<8xf32> to vector<8x1xf32>
    %cst_40 = arith.constant 0.00154320989 : f32
    %110 = vector.broadcast %cst_40 : f32 to vector<8x1xf32>
    %111 = arith.mulf %109, %110 : vector<8x1xf32>
    %cst_41 = arith.constant 0.000000e+00 : f32
    %112 = vector.broadcast %cst_41 : f32 to vector<8x324xf32>
    %c0_i32_42 = arith.constant 0 : i32
    %113 = arith.index_cast %c0_i32_42 : i32 to index
    %c0_43 = arith.constant 0 : index
    %c0_44 = arith.constant 0 : index
    %114 = vector.load %arg3[%113, %c0_43, %c0_44] : memref<2x8x324xf32, #tpu.memory_space<vmem>>, vector<1x8x324xf32>
    %115 = vector.shape_cast %114 : vector<1x8x324xf32> to vector<8x324xf32>
    %116 = vector.broadcast %111 : vector<8x1xf32> to vector<8x324xf32>
    %117 = arith.subf %115, %116 : vector<8x324xf32>
    %118 = arith.mulf %117, %117 : vector<8x324xf32>
    %119 = arith.addf %112, %118 : vector<8x324xf32>
    %c1_i32_45 = arith.constant 1 : i32
    %120 = arith.index_cast %c1_i32_45 : i32 to index
    %c0_46 = arith.constant 0 : index
    %c0_47 = arith.constant 0 : index
    %121 = vector.load %arg3[%120, %c0_46, %c0_47] : memref<2x8x324xf32, #tpu.memory_space<vmem>>, vector<1x8x324xf32>
    %122 = vector.shape_cast %121 : vector<1x8x324xf32> to vector<8x324xf32>
    %123 = vector.broadcast %111 : vector<8x1xf32> to vector<8x324xf32>
    %124 = arith.subf %122, %123 : vector<8x324xf32>
    %125 = arith.mulf %124, %124 : vector<8x324xf32>
    %126 = arith.addf %119, %125 : vector<8x324xf32>
    %c2_i32_48 = arith.constant 2 : i32
    %cst_49 = arith.constant dense<0.000000e+00> : vector<8xf32>
    %127 = vector.multi_reduction <add>, %126, %cst_49 [1] : vector<8x324xf32> to vector<8xf32>
    %128 = vector.shape_cast %127 : vector<8xf32> to vector<8x1xf32>
    %cst_50 = arith.constant 0.00154320989 : f32
    %129 = vector.broadcast %cst_50 : f32 to vector<8x1xf32>
    %130 = arith.mulf %128, %129 : vector<8x1xf32>
    %cst_51 = arith.constant 9.99999974E-6 : f32
    %131 = vector.broadcast %cst_51 : f32 to vector<8x1xf32>
    %132 = arith.addf %130, %131 : vector<8x1xf32>
    %133 = math.sqrt %132 : vector<8x1xf32>
    %cst_52 = arith.constant 1.000000e+00 : f32
    %134 = vector.broadcast %cst_52 : f32 to vector<8x1xf32>
    %135 = arith.divf %134, %133 : vector<8x1xf32>
    %136 = arith.mulf %21, %135 : vector<8x1xf32>
    %137 = arith.mulf %111, %136 : vector<8x1xf32>
    %138 = arith.subf %22, %137 : vector<8x1xf32>
    %139 = arith.mulf %23, %135 : vector<8x1xf32>
    %140 = arith.mulf %111, %139 : vector<8x1xf32>
    %141 = arith.subf %24, %140 : vector<8x1xf32>
    %c0_i32_53 = arith.constant 0 : i32
    %142 = arith.index_cast %c0_i32_53 : i32 to index
    %c0_54 = arith.constant 0 : index
    %c0_55 = arith.constant 0 : index
    %143 = vector.load %arg3[%142, %c0_54, %c0_55] : memref<2x8x324xf32, #tpu.memory_space<vmem>>, vector<1x8x324xf32>
    %144 = vector.shape_cast %143 : vector<1x8x324xf32> to vector<8x324xf32>
    %145 = vector.broadcast %136 : vector<8x1xf32> to vector<8x324xf32>
    %146 = arith.mulf %145, %144 : vector<8x324xf32>
    %147 = vector.broadcast %138 : vector<8x1xf32> to vector<8x324xf32>
    %148 = arith.addf %146, %147 : vector<8x324xf32>
    %c0_56 = arith.constant 0 : index
    %149 = arith.index_cast %c0_i32_53 : i32 to index
    %c0_57 = arith.constant 0 : index
    %c0_58 = arith.constant 0 : index
    %150 = vector.load %arg2[%c0_56, %149, %c0_57, %c0_58] : memref<3x2x8x324xf32, #tpu.memory_space<vmem>>, vector<1x1x8x324xf32>
    %151 = vector.shape_cast %150 : vector<1x1x8x324xf32> to vector<8x324xf32>
    %152 = vector.shape_cast %148 : vector<8x324xf32> to vector<1x1x8x324xf32>
    tpu.vector_store %arg2[%c0_56, %149, %c0_57, %c0_58], %152 {strides = array<i32>} : memref<3x2x8x324xf32, #tpu.memory_space<vmem>>, vector<1x1x8x324xf32>,
    %153 = vector.broadcast %139 : vector<8x1xf32> to vector<8x324xf32>
    %154 = arith.mulf %153, %144 : vector<8x324xf32>
    %155 = vector.broadcast %141 : vector<8x1xf32> to vector<8x324xf32>
    %156 = arith.addf %154, %155 : vector<8x324xf32>
    %c1_59 = arith.constant 1 : index
    %157 = arith.index_cast %c0_i32_53 : i32 to index
    %c0_60 = arith.constant 0 : index
    %c0_61 = arith.constant 0 : index
    %158 = vector.load %arg2[%c1_59, %157, %c0_60, %c0_61] : memref<3x2x8x324xf32, #tpu.memory_space<vmem>>, vector<1x1x8x324xf32>
    %159 = vector.shape_cast %158 : vector<1x1x8x324xf32> to vector<8x324xf32>
    %160 = vector.shape_cast %156 : vector<8x324xf32> to vector<1x1x8x324xf32>
    tpu.vector_store %arg2[%c1_59, %157, %c0_60, %c0_61], %160 {strides = array<i32>} : memref<3x2x8x324xf32, #tpu.memory_space<vmem>>, vector<1x1x8x324xf32>,
    %cst_62 = arith.constant 0.000000e+00 : f32
    %161 = vector.broadcast %cst_62 : f32 to vector<8x324xf32>
    %162 = arith.subf %161, %144 : vector<8x324xf32>
    %163 = math.exp %162 : vector<8x324xf32>
    %cst_63 = arith.constant 1.000000e+00 : f32
    %164 = vector.broadcast %cst_63 : f32 to vector<8x324xf32>
    %165 = arith.addf %164, %163 : vector<8x324xf32>
    %cst_64 = arith.constant 1.000000e+00 : f32
    %166 = vector.broadcast %cst_64 : f32 to vector<8x324xf32>
    %167 = arith.divf %166, %165 : vector<8x324xf32>
    %c2_65 = arith.constant 2 : index
    %168 = arith.index_cast %c0_i32_53 : i32 to index
    %c0_66 = arith.constant 0 : index
    %c0_67 = arith.constant 0 : index
    %169 = vector.load %arg2[%c2_65, %168, %c0_66, %c0_67] : memref<3x2x8x324xf32, #tpu.memory_space<vmem>>, vector<1x1x8x324xf32>
    %170 = vector.shape_cast %169 : vector<1x1x8x324xf32> to vector<8x324xf32>
    %171 = vector.shape_cast %167 : vector<8x324xf32> to vector<1x1x8x324xf32>
    tpu.vector_store %arg2[%c2_65, %168, %c0_66, %c0_67], %171 {strides = array<i32>} : memref<3x2x8x324xf32, #tpu.memory_space<vmem>>, vector<1x1x8x324xf32>,
    %c1_i32_68 = arith.constant 1 : i32
    %172 = arith.index_cast %c1_i32_68 : i32 to index
    %c0_69 = arith.constant 0 : index
    %c0_70 = arith.constant 0 : index
    %173 = vector.load %arg3[%172, %c0_69, %c0_70] : memref<2x8x324xf32, #tpu.memory_space<vmem>>, vector<1x8x324xf32>
    %174 = vector.shape_cast %173 : vector<1x8x324xf32> to vector<8x324xf32>
    %175 = vector.broadcast %136 : vector<8x1xf32> to vector<8x324xf32>
    %176 = arith.mulf %175, %174 : vector<8x324xf32>
    %177 = vector.broadcast %138 : vector<8x1xf32> to vector<8x324xf32>
    %178 = arith.addf %176, %177 : vector<8x324xf32>
    %c0_71 = arith.constant 0 : index
    %179 = arith.index_cast %c1_i32_68 : i32 to index
    %c0_72 = arith.constant 0 : index
    %c0_73 = arith.constant 0 : index
    %180 = vector.load %arg2[%c0_71, %179, %c0_72, %c0_73] : memref<3x2x8x324xf32, #tpu.memory_space<vmem>>, vector<1x1x8x324xf32>
    %181 = vector.shape_cast %180 : vector<1x1x8x324xf32> to vector<8x324xf32>
    %182 = vector.shape_cast %178 : vector<8x324xf32> to vector<1x1x8x324xf32>
    tpu.vector_store %arg2[%c0_71, %179, %c0_72, %c0_73], %182 {strides = array<i32>} : memref<3x2x8x324xf32, #tpu.memory_space<vmem>>, vector<1x1x8x324xf32>,
    %183 = vector.broadcast %139 : vector<8x1xf32> to vector<8x324xf32>
    %184 = arith.mulf %183, %174 : vector<8x324xf32>
    %185 = vector.broadcast %141 : vector<8x1xf32> to vector<8x324xf32>
    %186 = arith.addf %184, %185 : vector<8x324xf32>
    %c1_74 = arith.constant 1 : index
    %187 = arith.index_cast %c1_i32_68 : i32 to index
    %c0_75 = arith.constant 0 : index
    %c0_76 = arith.constant 0 : index
    %188 = vector.load %arg2[%c1_74, %187, %c0_75, %c0_76] : memref<3x2x8x324xf32, #tpu.memory_space<vmem>>, vector<1x1x8x324xf32>
    %189 = vector.shape_cast %188 : vector<1x1x8x324xf32> to vector<8x324xf32>
    %190 = vector.shape_cast %186 : vector<8x324xf32> to vector<1x1x8x324xf32>
    tpu.vector_store %arg2[%c1_74, %187, %c0_75, %c0_76], %190 {strides = array<i32>} : memref<3x2x8x324xf32, #tpu.memory_space<vmem>>, vector<1x1x8x324xf32>,
    %cst_77 = arith.constant 0.000000e+00 : f32
    %191 = vector.broadcast %cst_77 : f32 to vector<8x324xf32>
    %192 = arith.subf %191, %174 : vector<8x324xf32>
    %193 = math.exp %192 : vector<8x324xf32>
    %cst_78 = arith.constant 1.000000e+00 : f32
    %194 = vector.broadcast %cst_78 : f32 to vector<8x324xf32>
    %195 = arith.addf %194, %193 : vector<8x324xf32>
    %cst_79 = arith.constant 1.000000e+00 : f32
    %196 = vector.broadcast %cst_79 : f32 to vector<8x324xf32>
    %197 = arith.divf %196, %195 : vector<8x324xf32>
    %c2_80 = arith.constant 2 : index
    %198 = arith.index_cast %c1_i32_68 : i32 to index
    %c0_81 = arith.constant 0 : index
    %c0_82 = arith.constant 0 : index
    %199 = vector.load %arg2[%c2_80, %198, %c0_81, %c0_82] : memref<3x2x8x324xf32, #tpu.memory_space<vmem>>, vector<1x1x8x324xf32>
    %200 = vector.shape_cast %199 : vector<1x1x8x324xf32> to vector<8x324xf32>
    %201 = vector.shape_cast %197 : vector<8x324xf32> to vector<1x1x8x324xf32>
    tpu.vector_store %arg2[%c2_80, %198, %c0_81, %c0_82], %201 {strides = array<i32>} : memref<3x2x8x324xf32, #tpu.memory_space<vmem>>, vector<1x1x8x324xf32>,
    %c2_i32_83 = arith.constant 2 : i32
    return
  }
}

</mosaic_0001>

<bundles_post_ra>
// kernel: model_forward.1
= control target key start
LH: loop header
LB: loop body
LE: loop exit
PB: predicated region body
PF: predicated region fallthrough
CT: control target
= control target key end

     0   :  { %v586_v0 = vmov 6   ;;  %v587_v1 = vmov 0   ;;  %v588_v3 = vmov 2   ;;  %v589_v4 = vmov 1   ;;  %s595_s16 = smov 1   ;;  %s871_s1 = inlined_call_operand.vmem [shape: f32[8,11], index: 1, kind: input, shape index: {}]   ;;  %s872_s0 = inlined_call_operand.vmem [shape: f32[2,6,324], index: 0, kind: input, shape index: {}]   ;;  %s873_s2 = inlined_call_operand.vmem [shape: f32[3,2,8,324], index: 2, kind: output, shape index: {}]  }
   0x1   :  { %548 = vset.pattern.permute.xlu1 %v586_v0  ;;  %546 = vset.pattern.permute.xlu0 %v587_v1  ;;  %v616_v2 = vld [vmem:[%s871_s1] sm:$0xff]  ;;  %v590_v5 = vmov 3   ;;  %v591_v6 = vmov 4   ;;  %v592_v7 = vmov 5   ;;  %v43_v8 = vlaneseq }
   0x2   :  { %38 = vperm.xlu1 %548, %v616_v2   ;;  %14 = vperm.xlu0 %546, %v616_v2   ;;  %v41_v13 = vld [vmem:[%s872_s0] ss:$8 sm:$0x7]  ;;  %v640_v15 = vld [vmem:[%s872_s0 + $0x2] ss:$8 sm:$0x7] }
   0x3   :  { %v44_v9 = vshrl.u32 %v43_v8, 7  ;;  %v513_v14 = vld [vmem:[%s872_s0 + $0x18] ss:$8 sm:$0x7]  ;;  %vm186_vm0 = vcmask 556032  }
   0x4   :  { %v645_v16 = vld [vmem:[%s872_s0 + $0x1a] ss:$8 sm:$0x7]  ;;  %v652_v19 = vld [vmem:[%s872_s0 + $0x1] ss:$8 sm:$0x7] }
   0x5   :  { %v625_v10 = vsub.s32 0, %v44_v9  ;;  %v627_v11 = vsub.s32 1, %v44_v9  ;;  %v629_v12 = vsub.s32 2, %v44_v9  ;;  %v661_v24 = vld [vmem:[%s872_s0 + $0x19] ss:$8 sm:$0x7] }
   0x6   :  { %549 = vset.pattern.permute.xlu1 %v588_v3  ;;  %547 = vset.pattern.permute.xlu0 %v589_v4  ;;  %v674_v29 = vld [vmem:[%s872_s0 + $0x3] ss:$8 sm:$0x7]  ;;  %v692_v35 = vld [vmem:[%s872_s0 + $0x4] ss:$8 sm:$0x7] }
   0x7   :  { %22 = vperm.xlu1 %549, %v616_v2   ;;  %18 = vperm.xlu0 %547, %v616_v2   ;;  %v46_v17 = vrot.slane %v41_v13, %v625_v10  ;;  %v50_v18 = vrot.slane %v41_v13, %v627_v11  ;;  %v54_v20 = vrot.slane %v41_v13, %v629_v12  ;;  %v679_v30 = vld [vmem:[%s872_s0 + $0x1b] ss:$8 sm:$0x7]  ;;  %v713_v44 = vld [vmem:[%s872_s0 + $0x1c] ss:$8 sm:$0x7] }
   0x8   :  { %v197_v21 = vrot.slane %v513_v14, %v625_v10  ;;  %v201_v22 = vrot.slane %v513_v14, %v627_v11  ;;  %v205_v23 = vrot.slane %v513_v14, %v629_v12  ;;  %v94_v25 = vrot.slane %v640_v15, %v625_v10  ;;  %v726_v51 = vld [vmem:[%s872_s0 + $0x5] ss:$8 sm:$0x7] }
   0x9   :  { %v98_v26 = vrot.slane %v640_v15, %v627_v11  ;;  %v102_v27 = vrot.slane %v640_v15, %v629_v12  ;;  %v245_v28 = vrot.slane %v645_v16, %v625_v10  ;;  %v249_v31 = vrot.slane %v645_v16, %v627_v11  ;;  %v731_v56 = vld [vmem:[%s872_s0 + $0x1d] ss:$8 sm:$0x7] }
   0xa   :  { %v253_v32 = vrot.slane %v645_v16, %v629_v12  ;;  %v70_v33 = vrot.slane %v652_v19, %v625_v10  ;;  %v74_v34 = vrot.slane %v652_v19, %v627_v11  ;;  %v78_v36 = vrot.slane %v652_v19, %v629_v12 }
   0xb   :  { %550 = vset.pattern.permute.xlu1 %v590_v5  ;;  %551 = vset.pattern.permute.xlu0 %v591_v6  ;;  %v221_v37 = vrot.slane %v661_v24, %v625_v10  ;;  %v225_v38 = vrot.slane %v661_v24, %v627_v11  ;;  %v229_v39 = vrot.slane %v661_v24, %v629_v12 }
   0xc   :  { %26 = vperm.xlu1 %550, %v616_v2   ;;  %30 = vperm.xlu0 %551, %v616_v2   ;;  %v118_v40 = vrot.slane %v674_v29, %v625_v10  ;;  %v122_v41 = vrot.slane %v674_v29, %v627_v11  ;;  %v126_v42 = vrot.slane %v674_v29, %v629_v12 }
   0xd   :  { %v269_v43 = vrot.slane %v679_v30, %v625_v10  ;;  %v273_v47 = vrot.slane %v679_v30, %v627_v11  ;;  %v277_v48 = vrot.slane %v679_v30, %v629_v12  ;;  %v142_v49 = vrot.slane %v692_v35, %v625_v10 }
   0xe   :  { %v146_v50 = vrot.slane %v692_v35, %v627_v11  ;;  %v150_v59 = vrot.slane %v692_v35, %v629_v12  ;;  %v293_v60 = vrot.slane %v713_v44, %v625_v10  ;;  %v166_v61 = vrot.slane %v726_v51, %v625_v10 }
   0xf   :  { %v170_v62 = vrot.slane %v726_v51, %v627_v11  ;;  %v297_v63 = vrot.slane %v713_v44, %v627_v11  ;;  %v301_v0 = vrot.slane %v713_v44, %v629_v12  ;;  %v174_v1 = vrot.slane %v726_v51, %v629_v12 }
  0x10   :  { %552 = vset.pattern.permute.xlu1 %v592_v7  ;;  %v317_v3 = vrot.slane %v731_v56, %v625_v10  ;;  %v321_v4 = vrot.slane %v731_v56, %v627_v11 }
  0x11   :  { %34 = vperm.xlu1 %552, %v616_v2  }
  0x81   :  { %v39_v45 = vpop.permute.xlu1 %38  ;;  %v15_v46 = vpop.permute.xlu0 %14 }
  0x82   :  { %v58_v52 = vmul.f32 %v46_v17, %v15_v46  ;;  %v59_v53 = vmul.f32 %v50_v18, %v15_v46  ;;  %v60_v54 = vmul.f32 %v54_v20, %v15_v46  ;;  %v209_v55 = vmul.f32 %v197_v21, %v15_v46 }
  0x83   :  { %v210_v57 = vmul.f32 %v201_v22, %v15_v46  ;;  %v211_v58 = vmul.f32 %v205_v23, %v15_v46 }
  0x84   :  { %v61_v6 = vadd.f32 %v58_v52, %v39_v45  ;;  %v62_v7 = vadd.f32 %v59_v53, %v39_v45  ;;  %v63_v8 = vadd.f32 %v60_v54, %v39_v45  ;;  %v212_v9 = vadd.f32 %v209_v55, %v39_v45 }
  0x85   :  { %v213_v15 = vadd.f32 %v210_v57, %v39_v45  ;;  %v214_v16 = vadd.f32 %v211_v58, %v39_v45 }
  0x86   :  { %v23_v13 = vpop.permute.xlu1 %22  ;;  %v19_v14 = vpop.permute.xlu0 %18 }
  0x87   :  { %v106_v17 = vmul.f32 %v94_v25, %v23_v13  ;;  %v107_v18 = vmul.f32 %v98_v26, %v23_v13  ;;  %v108_v19 = vmul.f32 %v102_v27, %v23_v13  ;;  %v257_v20 = vmul.f32 %v245_v28, %v23_v13 }
  0x88   :  { %v82_v21 = vmul.f32 %v70_v33, %v19_v14  ;;  %v83_v22 = vmul.f32 %v74_v34, %v19_v14  ;;  %v84_v23 = vmul.f32 %v78_v36, %v19_v14  ;;  %v233_v24 = vmul.f32 %v221_v37, %v19_v14 }
  0x89   :  { %v234_v29 = vmul.f32 %v225_v38, %v19_v14  ;;  %v235_v30 = vmul.f32 %v229_v39, %v19_v14  ;;  %v258_v35 = vmul.f32 %v249_v31, %v23_v13  ;;  %v259_v46 = vmul.f32 %v253_v32, %v23_v13 }
  0x8a   :  { %v85_v51 = vadd.f32 %v82_v21, %v61_v6  ;;  %v86_v52 = vadd.f32 %v83_v22, %v62_v7  ;;  %v87_v53 = vadd.f32 %v84_v23, %v63_v8  ;;  %v236_v54 = vadd.f32 %v233_v24, %v212_v9 }
  0x8b   :  { %v237_v55 = vadd.f32 %v234_v29, %v213_v15  ;;  %v238_v5 = vadd.f32 %v235_v30, %v214_v16  ;;  %v27_v57 = vpop.permute.xlu1 %26  ;;  %v31_v45 = vpop.permute.xlu0 %30 }
  0x8c   :  { %v130_v25 = vmul.f32 %v118_v40, %v27_v57  ;;  %v131_v26 = vmul.f32 %v122_v41, %v27_v57  ;;  %v132_v27 = vmul.f32 %v126_v42, %v27_v57  ;;  %v281_v28 = vmul.f32 %v269_v43, %v27_v57 }
  0x8d   :  { %v282_v33 = vmul.f32 %v273_v47, %v27_v57  ;;  %v283_v34 = vmul.f32 %v277_v48, %v27_v57  ;;  %v109_v36 = vadd.f32 %v106_v17, %v85_v51  ;;  %v110_v37 = vadd.f32 %v107_v18, %v86_v52 }
  0x8e   :  { %v111_v38 = vadd.f32 %v108_v19, %v87_v53  ;;  %v154_v31 = vmul.f32 %v142_v49, %v31_v45  ;;  %v155_v32 = vmul.f32 %v146_v50, %v31_v45  ;;  %v156_v39 = vmul.f32 %v150_v59, %v31_v45 }
  0x8f   :  { %v133_v58 = vadd.f32 %v130_v25, %v109_v36  ;;  %v134_v6 = vadd.f32 %v131_v26, %v110_v37  ;;  %v260_v7 = vadd.f32 %v257_v20, %v236_v54  ;;  %v261_v8 = vadd.f32 %v258_v35, %v237_v55 }
  0x90   :  { %v35_v9 = vpop.permute.xlu1 %34  ;;  %v135_v13 = vadd.f32 %v132_v27, %v111_v38  ;;  %v262_v14 = vadd.f32 %v259_v46, %v238_v5  ;;  %v305_v15 = vmul.f32 %v293_v60, %v31_v45  ;;  %v306_v40 = vmul.f32 %v297_v63, %v31_v45 }
  0x91   :  { %v157_v41 = vadd.f32 %v154_v31, %v133_v58  ;;  %v158_v42 = vadd.f32 %v155_v32, %v134_v6  ;;  %v178_v43 = vmul.f32 %v166_v61, %v35_v9  ;;  %v179_v47 = vmul.f32 %v170_v62, %v35_v9 }
  0x92   :  { %v159_v48 = vadd.f32 %v156_v39, %v135_v13  ;;  %v180_v16 = vmul.f32 %v174_v1, %v35_v9  ;;  %v284_v17 = vadd.f32 %v281_v28, %v260_v7  ;;  %v285_v18 = vadd.f32 %v282_v33, %v261_v8 }
  0x93   :  { %v753_v49 = vadd.f32 %v178_v43, %v157_v41  ;;  %v755_v50 = vadd.f32 %v179_v47, %v158_v42  ;;  %v286_v59 = vadd.f32 %v283_v34, %v262_v14  ;;  %v307_v19 = vmul.f32 %v301_v0, %v31_v45 }
  0x94   :  { %v183_v5 = vadd.f32 %v180_v16, %v159_v48  ;;  %v308_v60 = vadd.f32 %v305_v15, %v284_v17  ;;  %v309_v63 = vadd.f32 %v306_v40, %v285_v18  ;;  %v329_v61 = vmul.f32 %v317_v3, %v35_v9 }
  0x95   :  { %v310_v62 = vadd.f32 %v307_v19, %v286_v59  ;;  %v330_v1 = vmul.f32 %v321_v4, %v35_v9  ;;  %v874_v20 = vrot.slane %v731_v56, %v629_v12  ;;  %v432_v22 = vsub.f32 0.0, %v753_v49 }
  0x96   :  { %187 = vst.msk [vmem:[#allocation2 + $0x10] sm:$0xff] %vm186_vm0, %v183_v5  ;;  %v771_v44 = vadd.f32 %v329_v61, %v308_v60  ;;  %v433_v0 = vsub.f32 0.0, %v755_v50 }
  0x97   :  { %v331_v21 = vmul.f32 %v874_v20, %v35_v9  ;;  %v774_v23 = vadd.f32 %v330_v1, %v309_v63  ;;  %v435_v3 = vmul.f32 1.442695, %v432_v22  ;;  %v593_v22 = vmov 7  }
  0x98   :  { %v339_v11 = vadd.f32 %v771_v44, %v753_v49  ;;  %v437_v4 = vmul.f32 1.442695, %v433_v0  ;;  %v477_v24 = vsub.f32 0.0, %v771_v44  ;;  %553 = vset.pattern.permute.xlu1 %v593_v22 }
  0x99   :  { %v334_v10 = vadd.f32 %v331_v21, %v310_v62  ;;  %v340_v12 = vadd.f32 %v774_v23, %v755_v50  ;;  %558 = vpow2.f32 %v435_v3  ;;  %v478_v29 = vsub.f32 0.0, %v774_v23 }
  0x9a   :  { %560 = vpow2.f32 %v437_v4  ;;  %v480_v30 = vmul.f32 1.442695, %v477_v24 }
  0x9b   :  { %338 = vst.msk [vmem:[#allocation2 + $0x28] sm:$0xff] %vm186_vm0, %v334_v10  ;;  %v341_v56 = vadd.f32 %v334_v10, %v183_v5  ;;  %v342_v35 = vadd.f32 %v340_v12, %v339_v11  ;;  %v482_v51 = vmul.f32 1.442695, %v478_v29  ;;  %v594_v29 = vmov 8  }
  0x9c   :  { %562 = vpow2.f32 %v480_v30  ;;  %555 = vset.pattern.permute.xlu0 %v594_v29 }
  0x9d   :  { %v343_v46 = vsel %vm186_vm0, %v341_v56, 0.0  ;;  %v784_v53 = vld [vmem:[#allocation2 + $0x10] sm:$0xff]  ;;  %564 = vpow2.f32 %v482_v51  ;;  %v596_v51 = vmov 9  }
  0x9e   :  { %v344_v52 = vadd.f32 %v343_v46, %v342_v35  ;;  %v434_v54 = vsub.f32 0.0, %v784_v53 }
  0xa0   :  { %345 = vadd.xlane.f32.xlu1 %v344_v52  ;;  %v439_v57 = vmul.f32 1.442695, %v434_v54  ;;  %v597_v52 = vmov 10  }
  0xa2   :  { %v787_v55 = vld [vmem:[#allocation2 + $0x28] sm:$0xff]  ;;  %566 = vpow2.f32 %v439_v57 }
  0xa3   :  { %v479_v45 = vsub.f32 0.0, %v787_v55  ;;  %v559_v25 = vpop.eup %558 }
  0xa4   :  { %v561_v27 = vpop.eup %560  ;;  %v441_v28 = vadd.f32 1.0, %v559_v25 }
  0xa5   :  { %v484_v26 = vmul.f32 1.442695, %v479_v45  ;;  %v442_v33 = vadd.f32 1.0, %v561_v27 }
  0xa6   :  { %v563_v34 = vpop.eup %562 }
  0xa7   :  { %568 = vpow2.f32 %v484_v26  ;;  %v565_v36 = vpop.eup %564  ;;  %v486_v37 = vadd.f32 1.0, %v563_v34 }
  0xa8   :  { %570 = vrcp.f32 %v441_v28  ;;  %v487_v38 = vadd.f32 1.0, %v565_v36 }
  0xa9   :  { %572 = vrcp.f32 %v442_v33 }
  0xaa   :  { %574 = vrcp.f32 %v486_v37 }
  0xab   :  { %576 = vrcp.f32 %v487_v38 }
  0xac   :  { %v567_v31 = vpop.eup %566 }
  0xad   :  { %v443_v32 = vadd.f32 1.0, %v567_v31 }
  0xaf   :  { %578 = vrcp.f32 %v443_v32 }
  0xb1   :  { %v569_v39 = vpop.eup %568 }
  0xb2   :  { %v571_v58 = vpop.eup %570  ;;  %v488_v6 = vadd.f32 1.0, %v569_v39 }
  0xb3   :  { %v573_v7 = vpop.eup %572  ;;  %522 = vst [vmem:[%s873_s2 + $0x60] sm:$0xff] %v571_v58 }
  0xb4   :  { %523 = vst [vmem:[%s873_s2 + $0x68] sm:$0xff] %v573_v7  ;;  %580 = vrcp.f32 %v488_v6  ;;  %v575_v8 = vpop.eup %574 }
  0xb5   :  { %v577_v9 = vpop.eup %576  ;;  %531 = vst [vmem:[%s873_s2 + $0x78] sm:$0xff] %v575_v8 }
  0xb6   :  { %532 = vst [vmem:[%s873_s2 + $0x80] sm:$0xff] %v577_v9 }
  0xb9   :  { %v579_v13 = vpop.eup %578 }
  0xba   :  { %524 = vst.msk [vmem:[%s873_s2 + $0x70] sm:$0xff] %vm186_vm0, %v579_v13 }
  0xbe   :  { %v581_v14 = vpop.eup %580 }
  0xbf   :  { %533 = vst.msk [vmem:[%s873_s2 + $0x88] sm:$0xff] %vm186_vm0, %v581_v14 }
 0x12d   :  { %v346_v15 = vpop.xlane.xlu1 %345 }
 0x12e   :  { %v347_v40 = vmul.f32 0.0015432099, %v346_v15 }
 0x130   :  { %v351_v41 = vsub.f32 %v753_v49, %v347_v40  ;;  %v352_v42 = vsub.f32 %v755_v50, %v347_v40  ;;  %v353_v43 = vsub.f32 %v784_v53, %v347_v40  ;;  %v363_v47 = vsub.f32 %v771_v44, %v347_v40 }
 0x131   :  { %v364_v48 = vsub.f32 %v774_v23, %v347_v40  ;;  %v365_v16 = vsub.f32 %v787_v55, %v347_v40 }
 0x132   :  { %v354_v17 = vmul.f32 %v351_v41, %v351_v41  ;;  %v355_v18 = vmul.f32 %v352_v42, %v352_v42  ;;  %v356_v59 = vmul.f32 %v353_v43, %v353_v43  ;;  %v366_v19 = vmul.f32 %v363_v47, %v363_v47 }
 0x133   :  { %v367_v5 = vmul.f32 %v364_v48, %v364_v48  ;;  %v368_v60 = vmul.f32 %v365_v16, %v365_v16 }
 0x134   :  { %v369_v63 = vadd.f32 %v366_v19, %v354_v17 }
 0x135   :  { %v370_v61 = vadd.f32 %v367_v5, %v355_v18  ;;  %v371_v62 = vadd.f32 %v368_v60, %v356_v59 }
 0x137   :  { %v372_v1 = vadd.f32 %v370_v61, %v369_v63  ;;  %v373_v20 = vsel %vm186_vm0, %v371_v62, 0.0 }
 0x139   :  { %v374_v21 = vadd.f32 %v373_v20, %v372_v1 }
 0x13b   :  { %375 = vadd.xlane.f32.xlu0 %v374_v21 }
 0x1c8   :  { %v376_v0 = vpop.xlane.xlu0 %375 }
 0x1c9   :  { %v377_v10 = vmul.f32 0.0015432099, %v376_v0 }
 0x1cb   :  { %v378_v3 = vadd.f32 1e-05, %v377_v10 }
 0x1cd   :  { %582 = vrsqrt.f32 %v378_v3  ;;  %vm381_vm1 = vcmp.eq.f32.partialorder %v378_v3, inf  ;;  %v384_v24 = vand.u32 2147483648, %v378_v3  ;;  %vm383_vm2 = vcmp.eq.f32.partialorder %v378_v3, 0.0 }
 0x1d7   :  { %v583_v11 = vpop.eup %582 }
 0x1d8   :  { %v380_v4 = vmul.f32 %v583_v11, %v378_v3 }
 0x1da   :  { %v382_v12 = vsel %vm381_vm1, %v378_v3, %v380_v4 }
 0x1db   :  { %v385_v56 = vsel %vm383_vm2, %v384_v24, %v382_v12 }
 0x1dc   :  { %584 = vrcp.f32 %v385_v56 }
 0x1e6   :  { %v585_v30 = vpop.eup %584 }
 0x1e7   :  { %v388_v35 = vmul.f32 %v585_v30, %v616_v2 }
 0x1e9   :  { %397 = vperm.xlu1 %553, %v388_v35   ;;  %v389_v46 = vmul.f32 %v388_v35, %v347_v40 }
 0x1eb   :  { %391 = vrot.lane.b32.xlu0 %v389_v46, %s595_s16 }
 0x1ed   :  { %554 = vset.pattern.permute.xlu1 %v596_v51 }
 0x1ee   :  { %415 = vperm.xlu1 %554, %v388_v35  }
 0x1f2   :  { %556 = vset.pattern.permute.xlu1 %v597_v52 }
 0x25d   :  { %v392_v54 = vpop.permute.xlu0 %391 }
 0x25e   :  { %v394_v57 = vsub.f32 %v616_v2, %v392_v54 }
 0x260   :  { %422 = vperm.xlu1 %556, %v394_v57   ;;  %405 = vperm.xlu0 %555, %v394_v57  }
 0x264   :  { %557 = vset.pattern.permute.xlu0 %v597_v52 }
 0x268   :  { %v398_v45 = vpop.permute.xlu1 %397 }
 0x269   :  { %v400_v26 = vmul.f32 %v398_v45, %v753_v49  ;;  %v401_v27 = vmul.f32 %v398_v45, %v755_v50  ;;  %v402_v28 = vmul.f32 %v398_v45, %v784_v53  ;;  %v457_v33 = vmul.f32 %v398_v45, %v771_v44 }
 0x26a   :  { %v458_v39 = vmul.f32 %v398_v45, %v774_v23  ;;  %v459_v58 = vmul.f32 %v398_v45, %v787_v55 }
 0x26d   :  { %v416_v25 = vpop.permute.xlu1 %415 }
 0x26e   :  { %v418_v34 = vmul.f32 %v416_v25, %v753_v49  ;;  %v419_v36 = vmul.f32 %v416_v25, %v755_v50  ;;  %v420_v37 = vmul.f32 %v416_v25, %v784_v53  ;;  %v467_v2 = vmul.f32 %v416_v25, %v771_v44 }
 0x26f   :  { %v468_v38 = vmul.f32 %v416_v25, %v774_v23  ;;  %v469_v31 = vmul.f32 %v416_v25, %v787_v55 }
 0x2df   :  { %v423_v32 = vpop.permute.xlu1 %422  ;;  %v406_v6 = vpop.permute.xlu0 %405 }
 0x2e0   :  { %v425_v7 = vadd.f32 %v423_v32, %v418_v34  ;;  %v426_v8 = vadd.f32 %v423_v32, %v419_v36  ;;  %v427_v9 = vadd.f32 %v423_v32, %v420_v37  ;;  %v470_v49 = vadd.f32 %v467_v2, %v423_v32 }
 0x2e1   :  { %v471_v13 = vadd.f32 %v468_v38, %v423_v32  ;;  %v472_v50 = vadd.f32 %v469_v31, %v423_v32  ;;  %v408_v14 = vadd.f32 %v406_v6, %v400_v26  ;;  %v409_v53 = vadd.f32 %v406_v6, %v401_v27 }
 0x2e2   :  { %519 = vst [vmem:[%s873_s2 + $0x30] sm:$0xff] %v425_v7  ;;  %520 = vst [vmem:[%s873_s2 + $0x38] sm:$0xff] %v426_v8  ;;  %v410_v44 = vadd.f32 %v406_v6, %v402_v28  ;;  %v460_v23 = vadd.f32 %v457_v33, %v406_v6  ;;  %v461_v55 = vadd.f32 %v458_v39, %v406_v6 }
 0x2e3   :  { %521 = vst.msk [vmem:[%s873_s2 + $0x40] sm:$0xff] %vm186_vm0, %v427_v9  ;;  %528 = vst [vmem:[%s873_s2 + $0x48] sm:$0xff] %v470_v49  ;;  %v462_v15 = vadd.f32 %v459_v58, %v406_v6 }
 0x2e4   :  { %529 = vst [vmem:[%s873_s2 + $0x50] sm:$0xff] %v471_v13  ;;  %530 = vst.msk [vmem:[%s873_s2 + $0x58] sm:$0xff] %vm186_vm0, %v472_v50 }
 0x2e5   :  { %411 = vst [vmem:[%s873_s2] sm:$0xff] %v408_v14  ;;  %412 = vst [vmem:[%s873_s2 + $0x8] sm:$0xff] %v409_v53 }
 0x2e6   :  { %413 = vst.msk [vmem:[%s873_s2 + $0x10] sm:$0xff] %vm186_vm0, %v410_v44  ;;  %525 = vst [vmem:[%s873_s2 + $0x18] sm:$0xff] %v460_v23 }
 0x2e7   :  { %526 = vst [vmem:[%s873_s2 + $0x20] sm:$0xff] %v461_v55  ;;  %527 = vst.msk [vmem:[%s873_s2 + $0x28] sm:$0xff] %vm186_vm0, %v462_v15 }

</bundles_post_ra>
